<compile_context>
chip_gen: v7x
topology: tpu7x:2x2x1
jax: 0.10.0
libtpu: 0.0.40
codegen_flags: <defaults>
</compile_context>

<pallas_src>
import functools

import jax
import jax.numpy as jnp
from jax.experimental import pallas as pl
from jax.experimental.pallas import tpu as pltpu


def _make_phi_kernel(d_in, training):
    def kernel(x_ref, bits_ref,
               w1_ref, b1_ref,
               w2_ref, b2_ref,
               w3_ref, b3_ref,
               w4_ref, b4_ref,
               o_ref):
        x = x_ref[...]                       # (tb, d_in) f32
        bits = bits_ref[...]                 # (tb, H) uint32 (one draw, 3 bit-planes)

        # ---- layer 1: Linear(D_in -> H) ----
        if d_in <= 8:
            # K is tiny: broadcast FMA chain on the VPU, skip the MXU pass.
            h = x[:, 0:1] * w1_ref[0:1, :]
            for k in range(1, d_in):
                h = h + x[:, k:k + 1] * w1_ref[k:k + 1, :]
            h = h + b1_ref[...]
        else:
            h = jnp.dot(x.astype(jnp.bfloat16),
                        w1_ref[...].astype(jnp.bfloat16),
                        preferred_element_type=jnp.float32) + b1_ref[...]
        h = jnp.maximum(h, 0.0)
        if training:
            h = jnp.where((bits & 1) != 0, h * 2.0, 0.0)

        # ---- layer 2: Linear(H -> H), bf16 MXU, f32 accumulation ----
        h = jnp.dot(h.astype(jnp.bfloat16), w2_ref[...],
                    preferred_element_type=jnp.float32) + b2_ref[...]
        h = jnp.maximum(h, 0.0)
        if training:
            h = jnp.where(((bits >> 1) & 1) != 0, h * 2.0, 0.0)

        # ---- layer 3: Linear(H -> H), bf16 MXU, f32 accumulation ----
        h = jnp.dot(h.astype(jnp.bfloat16), w3_ref[...],
                    preferred_element_type=jnp.float32) + b3_ref[...]
        h = jnp.maximum(h, 0.0)
        if training:
            h = jnp.where(((bits >> 2) & 1) != 0, h * 2.0, 0.0)

        # ---- layer 4: Linear(H -> 1) as VPU multiply + lane reduction ----
        o_ref[...] = (jnp.sum(h * w4_ref[...], axis=-1, keepdims=True)
                      + b4_ref[...])

    return kernel


def _pick_tile_b(B):
    for t in (512, 256, 128):
        if B % t == 0:
            return t
    return B


def phi_forward(x, params, key, *, training=True, tile_b=None):
    """x: [B, D_in] float32.

    params: w1 [D_in,H] f32, b1 [1,H] f32, w2/w3 [H,H] bf16, b2/b3 [1,H] f32,
            w4 [1,H] f32 (row vector), b4 [1,1] f32.
    key: jax PRNG key used for the dropout masks.
    """
    B, D_in = x.shape
    H = params["w1"].shape[1]
    if tile_b is None:
        tile_b = _pick_tile_b(B)
    assert B % tile_b == 0
    assert tile_b % 8 == 0 or tile_b == B

    w1, b1 = params["w1"], params["b1"]
    w2, b2 = params["w2"], params["b2"]
    w3, b3 = params["w3"], params["b3"]
    w4, b4 = params["w4"], params["b4"]

    # One random-bits draw; the kernel slices three independent bit-planes
    # (bits&1, bits>>1&1, bits>>2&1) for the three dropout layers.
    bits = jax.random.bits(key, (B, H), dtype=jnp.uint32)

    grid = (B // tile_b,)
    full = lambda i: (0, 0)

    # Rough VMEM budget: weights (+double-buffered activations); capped so it
    # is safe on v7x's 64 MiB physical VMEM.
    weight_bytes = sum(int(a.size) * a.dtype.itemsize
                       for a in (w1, b1, w2, b2, w3, b3, w4, b4))
    act_bytes = tile_b * (D_in + 2 * H + 1) * 4
    vmem_limit = int(min(64 * 1024 * 1024,
                         max(32 * 1024 * 1024, 2 * (weight_bytes + 2 * act_bytes))))

    kernel = _make_phi_kernel(D_in, training)

    return pl.pallas_call(
        kernel,
        out_shape=jax.ShapeDtypeStruct((B, 1), jnp.float32),
        grid=grid,
        in_specs=[
            pl.BlockSpec((tile_b, D_in), lambda i: (i, 0)),   # x tile
            pl.BlockSpec((tile_b, H), lambda i: (i, 0)),      # dropout bits tile
            pl.BlockSpec((D_in, H), full),                    # w1 (f32)
            pl.BlockSpec((1, H), full),                       # b1
            pl.BlockSpec((H, H), full),                       # w2 (bf16)
            pl.BlockSpec((1, H), full),                       # b2
            pl.BlockSpec((H, H), full),                       # w3 (bf16)
            pl.BlockSpec((1, H), full),                       # b3
            pl.BlockSpec((1, H), full),                       # w4 row (f32)
            pl.BlockSpec((1, 1), full),                       # b4
        ],
        out_specs=pl.BlockSpec((tile_b, 1), lambda i: (i, 0)),
        compiler_params=pltpu.CompilerParams(
            dimension_semantics=("parallel",),
            vmem_limit_bytes=vmem_limit),
    )(x, bits, w1, b1, w2, b2, w3, b3, w4, b4)


def init_phi_params(key, input_size, n_hidden):
    """Init mirroring nn.Linear default (uniform +/- 1/sqrt(fan_in)).

    Kernel layout: weights [in, out]; w2/w3 stored bf16 (MXU-native), w4 stored
    as a (1, H) row for the final lane reduction."""
    def linear(key, fan_in, fan_out):
        kw, kb = jax.random.split(key)
        bound = 1.0 / jnp.sqrt(jnp.float32(fan_in))
        w = jax.random.uniform(kw, (fan_in, fan_out), jnp.float32, -bound, bound)
        b = jax.random.uniform(kb, (1, fan_out), jnp.float32, -bound, bound)
        return w, b

    k1, k2, k3, k4 = jax.random.split(key, 4)
    w1, b1 = linear(k1, input_size, n_hidden)
    w2, b2 = linear(k2, n_hidden, n_hidden)
    w3, b3 = linear(k3, n_hidden, n_hidden)
    w4, b4 = linear(k4, n_hidden, 1)
    return dict(
        w1=w1, b1=b1,
        w2=w2.astype(jnp.bfloat16), b2=b2,
        w3=w3.astype(jnp.bfloat16), b3=b3,
        w4=w4.reshape(1, n_hidden), b4=b4.reshape(1, 1),
    )


if __name__ == "__main__":
    key = jax.random.PRNGKey(0)
    k_params, k_x, k_drop = jax.random.split(key, 3)

    # Small, module-consistent shapes: input_size=3 (module default),
    # hidden scaled down from 2048 -> 256 to keep the example small.
    B, D_IN, H = 8, 3, 256

    params = init_phi_params(k_params, D_IN, H)
    x = jax.random.normal(k_x, (B, D_IN), dtype=jnp.float32)

    out = phi_forward(x, params, k_drop, training=True)
    out = jax.block_until_ready(out)
    assert out.shape == (B, 1) and out.dtype == jnp.float32

    print("KERNEL_OK")
</pallas_src>

<mosaic_0001>
module attributes {stable_mosaic.version = 11 : i64} {
  func.func @kernel(%arg0: i32, %arg1: memref<8x3xf32, #tpu.memory_space<vmem>>, %arg2: memref<8x256xi32, #tpu.memory_space<vmem>>, %arg3: memref<3x256xf32, #tpu.memory_space<vmem>>, %arg4: memref<1x256xf32, #tpu.memory_space<vmem>>, %arg5: memref<256x256xbf16, #tpu.memory_space<vmem>>, %arg6: memref<1x256xf32, #tpu.memory_space<vmem>>, %arg7: memref<256x256xbf16, #tpu.memory_space<vmem>>, %arg8: memref<1x256xf32, #tpu.memory_space<vmem>>, %arg9: memref<1x256xf32, #tpu.memory_space<vmem>>, %arg10: memref<1x1xf32, #tpu.memory_space<vmem>>, %arg11: memref<8x1xf32, #tpu.memory_space<vmem>>) attributes {dimension_semantics = [#tpu.dimension_semantics<parallel>], iteration_bounds = array<i64: 1>, scalar_prefetch = 0 : i64, scratch_operands = 0 : i64, tpu.core_type = #tpu.core_type<tc>, window_params = [{transform_indices = @transform_0, window_bounds = array<i64: 8, 3>}, {transform_indices = @transform_1, window_bounds = array<i64: 8, 256>}, {pipeline_mode = #tpu.pipeline_mode<synchronous>, transform_indices = @transform_2, window_bounds = array<i64: 3, 256>}, {pipeline_mode = #tpu.pipeline_mode<synchronous>, transform_indices = @transform_3, window_bounds = array<i64: 1, 256>}, {pipeline_mode = #tpu.pipeline_mode<synchronous>, transform_indices = @transform_4, window_bounds = array<i64: 256, 256>}, {pipeline_mode = #tpu.pipeline_mode<synchronous>, transform_indices = @transform_5, window_bounds = array<i64: 1, 256>}, {pipeline_mode = #tpu.pipeline_mode<synchronous>, transform_indices = @transform_6, window_bounds = array<i64: 256, 256>}, {pipeline_mode = #tpu.pipeline_mode<synchronous>, transform_indices = @transform_7, window_bounds = array<i64: 1, 256>}, {pipeline_mode = #tpu.pipeline_mode<synchronous>, transform_indices = @transform_8, window_bounds = array<i64: 1, 256>}, {pipeline_mode = #tpu.pipeline_mode<synchronous>, transform_indices = @transform_9, window_bounds = array<i64: 1, 1>}, {transform_indices = @transform_10, window_bounds = array<i64: 8, 1>}]} {
    %c0 = arith.constant 0 : index
    %c0_0 = arith.constant 0 : index
    %0 = vector.load %arg1[%c0, %c0_0] : memref<8x3xf32, #tpu.memory_space<vmem>>, vector<8x3xf32>
    %c0_1 = arith.constant 0 : index
    %c0_2 = arith.constant 0 : index
    %1 = vector.load %arg2[%c0_1, %c0_2] : memref<8x256xi32, #tpu.memory_space<vmem>>, vector<8x256xi32>
    %2 = vector.extract_strided_slice %0 {offsets = [0, 0], sizes = [8, 1], strides = [1, 1]} : vector<8x3xf32> to vector<8x1xf32>
    %c0_3 = arith.constant 0 : index
    %c0_4 = arith.constant 0 : index
    %3 = vector.load %arg3[%c0_3, %c0_4] : memref<3x256xf32, #tpu.memory_space<vmem>>, vector<1x256xf32>
    %4 = vector.broadcast %2 : vector<8x1xf32> to vector<8x256xf32>
    %5 = vector.broadcast %3 : vector<1x256xf32> to vector<8x256xf32>
    %6 = arith.mulf %4, %5 : vector<8x256xf32>
    %7 = vector.extract_strided_slice %0 {offsets = [0, 1], sizes = [8, 1], strides = [1, 1]} : vector<8x3xf32> to vector<8x1xf32>
    %c1 = arith.constant 1 : index
    %c0_5 = arith.constant 0 : index
    %8 = vector.load %arg3[%c1, %c0_5] : memref<3x256xf32, #tpu.memory_space<vmem>>, vector<1x256xf32>
    %9 = vector.broadcast %7 : vector<8x1xf32> to vector<8x256xf32>
    %10 = vector.broadcast %8 : vector<1x256xf32> to vector<8x256xf32>
    %11 = arith.mulf %9, %10 : vector<8x256xf32>
    %12 = arith.addf %6, %11 : vector<8x256xf32>
    %13 = vector.extract_strided_slice %0 {offsets = [0, 2], sizes = [8, 1], strides = [1, 1]} : vector<8x3xf32> to vector<8x1xf32>
    %c2 = arith.constant 2 : index
    %c0_6 = arith.constant 0 : index
    %14 = vector.load %arg3[%c2, %c0_6] : memref<3x256xf32, #tpu.memory_space<vmem>>, vector<1x256xf32>
    %15 = vector.broadcast %13 : vector<8x1xf32> to vector<8x256xf32>
    %16 = vector.broadcast %14 : vector<1x256xf32> to vector<8x256xf32>
    %17 = arith.mulf %15, %16 : vector<8x256xf32>
    %18 = arith.addf %12, %17 : vector<8x256xf32>
    %c0_7 = arith.constant 0 : index
    %c0_8 = arith.constant 0 : index
    %19 = vector.load %arg4[%c0_7, %c0_8] : memref<1x256xf32, #tpu.memory_space<vmem>>, vector<1x256xf32>
    %20 = vector.broadcast %19 : vector<1x256xf32> to vector<8x256xf32>
    %21 = arith.addf %18, %20 : vector<8x256xf32>
    %cst = arith.constant 0.000000e+00 : f32
    %22 = vector.broadcast %cst : f32 to vector<8x256xf32>
    %23 = arith.maximumf %21, %22 : vector<8x256xf32>
    %c1_i32 = arith.constant 1 : i32
    %24 = vector.broadcast %c1_i32 : i32 to vector<8x256xi32>
    %25 = arith.andi %1, %24 : vector<8x256xi32>
    %c0_i32 = arith.constant 0 : i32
    %26 = vector.broadcast %c0_i32 : i32 to vector<8x256xi32>
    %27 = arith.cmpi ne, %25, %26 : vector<8x256xi32>
    %cst_9 = arith.constant 2.000000e+00 : f32
    %28 = vector.broadcast %cst_9 : f32 to vector<8x256xf32>
    %29 = arith.mulf %23, %28 : vector<8x256xf32>
    %cst_10 = arith.constant 0.000000e+00 : f32
    %30 = vector.broadcast %cst_10 : f32 to vector<8x256xf32>
    %31 = arith.select %27, %29, %30 : vector<8x256xi1>, vector<8x256xf32>
    %32 = arith.truncf %31 : vector<8x256xf32> to vector<8x256xbf16>
    %c0_11 = arith.constant 0 : index
    %c0_12 = arith.constant 0 : index
    %33 = vector.load %arg5[%c0_11, %c0_12] : memref<256x256xbf16, #tpu.memory_space<vmem>>, vector<256x256xbf16>
    %cst_13 = arith.constant dense<0.000000e+00> : vector<8x256xf32>
    %34 = tpu.matmul %32, %33, %cst_13 {dimension_numbers = #tpu.dot_dimension_numbers<[1], [0], [0], [1], [0, 0, 1, 1], [], []>} : vector<8x256xbf16>, vector<256x256xbf16>, vector<8x256xf32> -> vector<8x256xf32>
    %c0_14 = arith.constant 0 : index
    %c0_15 = arith.constant 0 : index
    %35 = vector.load %arg6[%c0_14, %c0_15] : memref<1x256xf32, #tpu.memory_space<vmem>>, vector<1x256xf32>
    %36 = vector.broadcast %35 : vector<1x256xf32> to vector<8x256xf32>
    %37 = arith.addf %34, %36 : vector<8x256xf32>
    %cst_16 = arith.constant 0.000000e+00 : f32
    %38 = vector.broadcast %cst_16 : f32 to vector<8x256xf32>
    %39 = arith.maximumf %37, %38 : vector<8x256xf32>
    %c1_i32_17 = arith.constant 1 : i32
    %40 = vector.broadcast %c1_i32_17 : i32 to vector<8x256xi32>
    %41 = arith.shrui %1, %40 : vector<8x256xi32>
    %c1_i32_18 = arith.constant 1 : i32
    %42 = vector.broadcast %c1_i32_18 : i32 to vector<8x256xi32>
    %43 = arith.andi %41, %42 : vector<8x256xi32>
    %c0_i32_19 = arith.constant 0 : i32
    %44 = vector.broadcast %c0_i32_19 : i32 to vector<8x256xi32>
    %45 = arith.cmpi ne, %43, %44 : vector<8x256xi32>
    %cst_20 = arith.constant 2.000000e+00 : f32
    %46 = vector.broadcast %cst_20 : f32 to vector<8x256xf32>
    %47 = arith.mulf %39, %46 : vector<8x256xf32>
    %cst_21 = arith.constant 0.000000e+00 : f32
    %48 = vector.broadcast %cst_21 : f32 to vector<8x256xf32>
    %49 = arith.select %45, %47, %48 : vector<8x256xi1>, vector<8x256xf32>
    %50 = arith.truncf %49 : vector<8x256xf32> to vector<8x256xbf16>
    %c0_22 = arith.constant 0 : index
    %c0_23 = arith.constant 0 : index
    %51 = vector.load %arg7[%c0_22, %c0_23] : memref<256x256xbf16, #tpu.memory_space<vmem>>, vector<256x256xbf16>
    %cst_24 = arith.constant dense<0.000000e+00> : vector<8x256xf32>
    %52 = tpu.matmul %50, %51, %cst_24 {dimension_numbers = #tpu.dot_dimension_numbers<[1], [0], [0], [1], [0, 0, 1, 1], [], []>} : vector<8x256xbf16>, vector<256x256xbf16>, vector<8x256xf32> -> vector<8x256xf32>
    %c0_25 = arith.constant 0 : index
    %c0_26 = arith.constant 0 : index
    %53 = vector.load %arg8[%c0_25, %c0_26] : memref<1x256xf32, #tpu.memory_space<vmem>>, vector<1x256xf32>
    %54 = vector.broadcast %53 : vector<1x256xf32> to vector<8x256xf32>
    %55 = arith.addf %52, %54 : vector<8x256xf32>
    %cst_27 = arith.constant 0.000000e+00 : f32
    %56 = vector.broadcast %cst_27 : f32 to vector<8x256xf32>
    %57 = arith.maximumf %55, %56 : vector<8x256xf32>
    %c2_i32 = arith.constant 2 : i32
    %58 = vector.broadcast %c2_i32 : i32 to vector<8x256xi32>
    %59 = arith.shrui %1, %58 : vector<8x256xi32>
    %c1_i32_28 = arith.constant 1 : i32
    %60 = vector.broadcast %c1_i32_28 : i32 to vector<8x256xi32>
    %61 = arith.andi %59, %60 : vector<8x256xi32>
    %c0_i32_29 = arith.constant 0 : i32
    %62 = vector.broadcast %c0_i32_29 : i32 to vector<8x256xi32>
    %63 = arith.cmpi ne, %61, %62 : vector<8x256xi32>
    %cst_30 = arith.constant 2.000000e+00 : f32
    %64 = vector.broadcast %cst_30 : f32 to vector<8x256xf32>
    %65 = arith.mulf %57, %64 : vector<8x256xf32>
    %cst_31 = arith.constant 0.000000e+00 : f32
    %66 = vector.broadcast %cst_31 : f32 to vector<8x256xf32>
    %67 = arith.select %63, %65, %66 : vector<8x256xi1>, vector<8x256xf32>
    %c0_32 = arith.constant 0 : index
    %c0_33 = arith.constant 0 : index
    %68 = vector.load %arg9[%c0_32, %c0_33] : memref<1x256xf32, #tpu.memory_space<vmem>>, vector<1x256xf32>
    %69 = vector.broadcast %68 : vector<1x256xf32> to vector<8x256xf32>
    %70 = arith.mulf %67, %69 : vector<8x256xf32>
    %cst_34 = arith.constant dense<0.000000e+00> : vector<8xf32>
    %71 = vector.multi_reduction <add>, %70, %cst_34 [1] : vector<8x256xf32> to vector<8xf32>
    %72 = vector.shape_cast %71 : vector<8xf32> to vector<8x1xf32>
    %c0_35 = arith.constant 0 : index
    %c0_36 = arith.constant 0 : index
    %73 = vector.load %arg10[%c0_35, %c0_36] : memref<1x1xf32, #tpu.memory_space<vmem>>, vector<1x1xf32>
    %74 = vector.broadcast %73 : vector<1x1xf32> to vector<8x1xf32>
    %75 = arith.addf %72, %74 : vector<8x1xf32>
    %c0_37 = arith.constant 0 : index
    %c0_38 = arith.constant 0 : index
    %76 = vector.load %arg11[%c0_37, %c0_38] : memref<8x1xf32, #tpu.memory_space<vmem>>, vector<8x1xf32>
    tpu.vector_store %arg11[%c0_37, %c0_38], %75 {strides = array<i32>} : memref<8x1xf32, #tpu.memory_space<vmem>>, vector<8x1xf32>,
    return
  }
  func.func @transform_0(%arg0: i32) -> (i32, i32) {
    %c0_i32 = arith.constant 0 : i32
    %c0_i32_0 = arith.constant 0 : i32
    return %arg0, %c0_i32 : i32, i32
  }
  func.func @transform_1(%arg0: i32) -> (i32, i32) {
    %c0_i32 = arith.constant 0 : i32
    %c0_i32_0 = arith.constant 0 : i32
    return %arg0, %c0_i32 : i32, i32
  }
  func.func @transform_2(%arg0: i32) -> (i32, i32) {
    %c0_i32 = arith.constant 0 : i32
    %c0_i32_0 = arith.constant 0 : i32
    %c0_i32_1 = arith.constant 0 : i32
    return %c0_i32, %c0_i32_0 : i32, i32
  }
  func.func @transform_3(%arg0: i32) -> (i32, i32) {
    %c0_i32 = arith.constant 0 : i32
    %c0_i32_0 = arith.constant 0 : i32
    %c0_i32_1 = arith.constant 0 : i32
    return %c0_i32, %c0_i32_0 : i32, i32
  }
  func.func @transform_4(%arg0: i32) -> (i32, i32) {
    %c0_i32 = arith.constant 0 : i32
    %c0_i32_0 = arith.constant 0 : i32
    %c0_i32_1 = arith.constant 0 : i32
    return %c0_i32, %c0_i32_0 : i32, i32
  }
  func.func @transform_5(%arg0: i32) -> (i32, i32) {
    %c0_i32 = arith.constant 0 : i32
    %c0_i32_0 = arith.constant 0 : i32
    %c0_i32_1 = arith.constant 0 : i32
    return %c0_i32, %c0_i32_0 : i32, i32
  }
  func.func @transform_6(%arg0: i32) -> (i32, i32) {
    %c0_i32 = arith.constant 0 : i32
    %c0_i32_0 = arith.constant 0 : i32
    %c0_i32_1 = arith.constant 0 : i32
    return %c0_i32, %c0_i32_0 : i32, i32
  }
  func.func @transform_7(%arg0: i32) -> (i32, i32) {
    %c0_i32 = arith.constant 0 : i32
    %c0_i32_0 = arith.constant 0 : i32
    %c0_i32_1 = arith.constant 0 : i32
    return %c0_i32, %c0_i32_0 : i32, i32
  }
  func.func @transform_8(%arg0: i32) -> (i32, i32) {
    %c0_i32 = arith.constant 0 : i32
    %c0_i32_0 = arith.constant 0 : i32
    %c0_i32_1 = arith.constant 0 : i32
    return %c0_i32, %c0_i32_0 : i32, i32
  }
  func.func @transform_9(%arg0: i32) -> (i32, i32) {
    %c0_i32 = arith.constant 0 : i32
    %c0_i32_0 = arith.constant 0 : i32
    %c0_i32_1 = arith.constant 0 : i32
    return %c0_i32, %c0_i32_0 : i32, i32
  }
  func.func @transform_10(%arg0: i32) -> (i32, i32) {
    %c0_i32 = arith.constant 0 : i32
    %c0_i32_0 = arith.constant 0 : i32
    return %arg0, %c0_i32 : i32, i32
  }
}

</mosaic_0001>

<bundles_post_ra>
// kernel: tpu_custom_call.1
= control target key start
LH: loop header
LB: loop body
LE: loop exit
PB: predicated region body
PF: predicated region fallthrough
CT: control target
= control target key end

     0   :  { %s1125_s0 = inlined_call_operand.vmem [shape: f32[8,3], index: 0, kind: input, shape index: {}]   ;;  %s1126_s1 = inlined_call_operand.vmem [shape: u32[8,256], index: 1, kind: input, shape index: {}]   ;;  %s1127_s2 = inlined_call_operand.hbm [shape: f32[3,256], index: 2, kind: input, shape index: {}]   ;;  %s1128_s3 = inlined_call_operand.vmem [shape: f32[1,256], index: 3, kind: input, shape index: {}]   ;;  %s1129_s4 = inlined_call_operand.hbm [shape: bf16[256,256], index: 4, kind: input, shape index: {}]   ;;  %s1130_s5 = inlined_call_operand.vmem [shape: f32[1,256], index: 5, kind: input, shape index: {}]   ;;  %s1131_s6 = inlined_call_operand.hbm [shape: bf16[256,256], index: 6, kind: input, shape index: {}]   ;;  %s1132_s7 = inlined_call_operand.vmem [shape: f32[1,256], index: 7, kind: input, shape index: {}]   ;;  %s1133_s8 = inlined_call_operand.vmem [shape: f32[1,256], index: 8, kind: input, shape index: {}]   ;;  %s1134_s9 = inlined_call_operand.<no memory space> [shape: f32[1,1], index: 9, kind: input, shape index: {}]   ;;  %s1135_s10 = inlined_call_operand.vmem [shape: f32[8,1], index: 10, kind: output, shape index: {}]  }
   0x1   :  { %v15_v0 = vstv %s1134_s9 }
   0x2   :  { %16 = vst [vmem:[#allocation2] sm:$0x1] %v15_v0 }
   0x3   :  { %17 = vsyncpa [#allocation4], 0 }
   0x4   :  { %18 = vsyncpa [#allocation6], 0  ;;  %s970_s15 = smov [#allocation5]   ;;  %s900_s19 = scalar_lea.hbm %s1129_s4, 4096 }
   0x5   :  { %s40_s16 = sshll.u32 %s970_s15, 4  ;;  %p901_p0 = scmp.ne.s32.totalorder %s1129_s4, %s900_s19  ;;  %s41_s16 = int_to_ptr.vmem [resolvable:$true] %s40_s16 }
   0x6   :  { %p904_p1 = scmp.lt.u32.totalorder %s900_s19, %s1129_s4 }
   0x8   :  { %p906_p2 = pnand %p904_p1, %p901_p0 }
   0xa   :  { %909 = shalt.err (!%p906_p2)
}
   0xb   :  { %s910_s9 = scalar_lea.vmem %s41_s16, 4096  ;;  %p915_p4 = scmp.lt.s32.totalorder %s41_s16, %s41_s16 }
   0xc   :  { %p911_p3 = scmp.ne.s32.totalorder %s41_s16, %s910_s9  ;;  %p916_p5 = scmp.lt.s32.totalorder %s910_s9, %s910_s9 }
   0xe   :  { %p917_p6 = por %p916_p5, %p915_p4 }
  0x10   :  { %p918_p7 = pnand %p917_p6, %p911_p3 }
  0x12   :  { %921 = shalt.err (!%p918_p7)
}
  0x13   :  { %s971_s24 = smov 128   ;;  %s972_s25 = smov 8  }
  0x14   :  { %46 = dma.hbm_to_vmem [thread:$0]  %s1129_s4, 4096, %s41_s16, [#allocation6], %s971_s24, %s971_s24, %s972_s25  }
  0x15   :  { %s973_s28 = smov [#allocation3]   ;;  %s974_s30 = smov [#allocation7]  }
  0x16   :  { %s29_s29 = sshll.u32 %s973_s28, 4  ;;  %s54_s11 = sshll.u32 %s974_s30, 4  ;;  %s30_s29 = int_to_ptr.vmem [resolvable:$true] %s29_s29  ;;  %s55_s11 = int_to_ptr.vmem [resolvable:$true] %s54_s11 }
  0x17   :  { %s922_s14 = scalar_lea.hbm %s1127_s2, 128 }
  0x18   :  { %p923_p8 = scmp.ne.s32.totalorder %s1127_s2, %s922_s14  ;;  %p926_p9 = scmp.lt.u32.totalorder %s922_s14, %s1127_s2 }
  0x1a   :  { %p928_p10 = pnand %p926_p9, %p923_p8 }
  0x1c   :  { %931 = shalt.err (!%p928_p10)
}
  0x1d   :  { %s932_s4 = scalar_lea.vmem %s30_s29, 128  ;;  %p937_p12 = scmp.lt.s32.totalorder %s30_s29, %s30_s29 }
  0x1e   :  { %p933_p11 = scmp.ne.s32.totalorder %s30_s29, %s932_s4  ;;  %p938_p13 = scmp.lt.s32.totalorder %s932_s4, %s932_s4 }
  0x20   :  { %p939_p0 = por %p938_p13, %p937_p12 }
  0x22   :  { %p940_p1 = pnand %p939_p0, %p933_p11 }
  0x24   :  { %943 = shalt.err (!%p940_p1)
}
  0x25   :  { %32 = dma.hbm_to_vmem [thread:$0]  %s1127_s2, 128, %s30_s29, [#allocation4]  }
  0x26   :  { %s944_s23 = scalar_lea.hbm %s1131_s6, 4096 }
  0x27   :  { %p945_p2 = scmp.ne.s32.totalorder %s1131_s6, %s944_s23  ;;  %p948_p3 = scmp.lt.u32.totalorder %s944_s23, %s1131_s6 }
  0x29   :  { %p950_p4 = pnand %p948_p3, %p945_p2 }
  0x2b   :  { %953 = shalt.err (!%p950_p4)
}
  0x2c   :  { %s954_s30 = scalar_lea.vmem %s55_s11, 4096  ;;  %p959_p6 = scmp.lt.s32.totalorder %s55_s11, %s55_s11 }
  0x2d   :  { %p955_p5 = scmp.ne.s32.totalorder %s55_s11, %s954_s30  ;;  %p960_p7 = scmp.lt.s32.totalorder %s954_s30, %s954_s30 }
  0x2f   :  { %p961_p8 = por %p960_p7, %p959_p6 }
  0x31   :  { %p962_p9 = pnand %p961_p8, %p955_p5 }
  0x33   :  { %965 = shalt.err (!%p962_p9)
}
  0x34   :  { %60 = dma.hbm_to_vmem [thread:$0]  %s1131_s6, 4096, %s55_s11, [#allocation6], %s971_s24, %s971_s24, %s972_s25  }
  0x35   :  { %966 = dma.done.wait [#allocation4], 128  }
  0x36   :  { %967 = vsyncadd [#allocation4], 4294967168 }
  0x37   :  { %968 = dma.done.wait [#allocation6], 8192  }
  0x38   :  { %969 = vsyncadd [#allocation6], 4294959104  ;;  %v975_v1 = vmov 0   ;;  %v976_v2 = vmov 2   ;;  %v76_v3 = vld [vmem:[%s1125_s0] sm:$0xff]  ;;  %v977_v8 = vmov 1   ;;  %v86_v0 = vlaneseq }
  0x39   :  { %800 = vset.pattern.permute.xlu0 %v975_v1  ;;  %802 = vset.pattern.permute.xlu1 %v976_v2  ;;  %v804_v4 = vld [vmem:[#allocation5 + $0x4] ss:$8 sps:$4 sm:$0xff]   ;;  %v806_v5 = vld [vmem:[#allocation5] ss:$8 sps:$4 sm:$0xff]   ;;  %v807_v6 = vld [vmem:[#allocation5 + $0x14] ss:$8 sps:$4 sm:$0xff]  }
  0x3a   :  { %82 = vperm.xlu0 %800, %v76_v3   ;;  %122 = vperm.xlu1 %802, %v76_v3   ;;  %v809_v7 = vld [vmem:[#allocation5 + $0x10] ss:$8 sps:$4 sm:$0xff]   ;;  %v810_v9 = vld [vmem:[#allocation5 + $0x24] ss:$8 sps:$4 sm:$0xff]   ;;  %v812_v10 = vld [vmem:[#allocation5 + $0x20] ss:$8 sps:$4 sm:$0xff]  }
  0x3b   :  { %370 = vmatprep.subr.bf16.mxu0 %v804_v4  ;;  %v813_v11 = vld [vmem:[#allocation5 + $0x34] ss:$8 sps:$4 sm:$0xff]   ;;  %v815_v12 = vld [vmem:[#allocation5 + $0x30] ss:$8 sps:$4 sm:$0xff]   ;;  %v816_v13 = vld [vmem:[#allocation5 + $0x44] ss:$8 sps:$4 sm:$0xff]  }
  0x3c   :  { %371 = vmatpush1.bf16.msra.mxu0 %v806_v5  ;;  %v818_v14 = vld [vmem:[#allocation5 + $0x40] ss:$8 sps:$4 sm:$0xff]   ;;  %v819_v15 = vld [vmem:[#allocation5 + $0x54] ss:$8 sps:$4 sm:$0xff]   ;;  %v821_v16 = vld [vmem:[#allocation5 + $0x50] ss:$8 sps:$4 sm:$0xff]  }
  0x3d   :  { %372 = vmatprep.subr.bf16.mxu0 %v807_v6  ;;  %v822_v17 = vld [vmem:[#allocation5 + $0x64] ss:$8 sps:$4 sm:$0xff]   ;;  %v824_v18 = vld [vmem:[#allocation5 + $0x60] ss:$8 sps:$4 sm:$0xff]   ;;  %v825_v19 = vld [vmem:[#allocation5 + $0x74] ss:$8 sps:$4 sm:$0xff]  }
  0x3e   :  { %801 = vset.pattern.permute.xlu0 %v977_v8  ;;  %v852_v20 = vld [vmem:[#allocation7 + $0x4] ss:$8 sps:$4 sm:$0xff]   ;;  %v854_v21 = vld [vmem:[#allocation7] ss:$8 sps:$4 sm:$0xff]   ;;  %v855_v22 = vld [vmem:[#allocation7 + $0x14] ss:$8 sps:$4 sm:$0xff]  }
  0x3f   :  { %101 = vperm.xlu0 %801, %v76_v3   ;;  %629 = vmatprep.subr.bf16.mxu1 %v852_v20  ;;  %v827_v23 = vld [vmem:[#allocation5 + $0x70] ss:$8 sps:$4 sm:$0xff]   ;;  %v858_v25 = vld [vmem:[#allocation7 + $0x24] ss:$8 sps:$4 sm:$0xff]   ;;  %v830_v27 = vld [vmem:[#allocation5 + $0x80] ss:$8 sps:$4 sm:$0xff]  }
  0x40   :  { %373 = vmatpush1.bf16.msra.mxu0 %v809_v7  ;;  %630 = vmatpush1.bf16.msra.mxu1 %v854_v21  ;;  %v857_v24 = vld [vmem:[#allocation7 + $0x10] ss:$8 sps:$4 sm:$0xff]   ;;  %v828_v26 = vld [vmem:[#allocation5 + $0x84] ss:$8 sps:$4 sm:$0xff]   ;;  %v860_v28 = vld [vmem:[#allocation7 + $0x20] ss:$8 sps:$4 sm:$0xff]  }
  0x41   :  { %374 = vmatprep.subr.bf16.mxu0 %v810_v9  ;;  %631 = vmatprep.subr.bf16.mxu1 %v855_v22  ;;  %v861_v29 = vld [vmem:[#allocation7 + $0x34] ss:$8 sps:$4 sm:$0xff]   ;;  %v833_v31 = vld [vmem:[#allocation5 + $0x90] ss:$8 sps:$4 sm:$0xff]   ;;  %v864_v33 = vld [vmem:[#allocation7 + $0x44] ss:$8 sps:$4 sm:$0xff]  }
  0x42   :  { %v831_v30 = vld [vmem:[#allocation5 + $0x94] ss:$8 sps:$4 sm:$0xff]   ;;  %v863_v32 = vld [vmem:[#allocation7 + $0x30] ss:$8 sps:$4 sm:$0xff]   ;;  %v834_v34 = vld [vmem:[#allocation5 + $0xa4] ss:$8 sps:$4 sm:$0xff]  }
  0x43   :  { %803 = vset.pattern.permute.xlu0 %v976_v2  ;;  %v836_v35 = vld [vmem:[#allocation5 + $0xa0] ss:$8 sps:$4 sm:$0xff]   ;;  %v867_v37 = vld [vmem:[#allocation7 + $0x54] ss:$8 sps:$4 sm:$0xff]   ;;  %v869_v39 = vld [vmem:[#allocation7 + $0x50] ss:$8 sps:$4 sm:$0xff]  }
  0x44   :  { %375 = vmatpush1.bf16.msra.mxu0 %v812_v10  ;;  %632 = vmatpush1.bf16.msra.mxu1 %v857_v24  ;;  %v866_v36 = vld [vmem:[#allocation7 + $0x40] ss:$8 sps:$4 sm:$0xff]   ;;  %v837_v38 = vld [vmem:[#allocation5 + $0xb4] ss:$8 sps:$4 sm:$0xff]   ;;  %v839_v40 = vld [vmem:[#allocation5 + $0xb0] ss:$8 sps:$4 sm:$0xff]  }
  0x45   :  { %376 = vmatprep.subr.bf16.mxu0 %v813_v11  ;;  %633 = vmatprep.subr.bf16.mxu1 %v858_v25  ;;  %v870_v41 = vld [vmem:[#allocation7 + $0x64] ss:$8 sps:$4 sm:$0xff]   ;;  %v872_v43 = vld [vmem:[#allocation7 + $0x60] ss:$8 sps:$4 sm:$0xff]   ;;  %v873_v45 = vld [vmem:[#allocation7 + $0x74] ss:$8 sps:$4 sm:$0xff]  }
  0x46   :  { %v840_v42 = vld [vmem:[#allocation5 + $0xc4] ss:$8 sps:$4 sm:$0xff]   ;;  %v842_v44 = vld [vmem:[#allocation5 + $0xc0] ss:$8 sps:$4 sm:$0xff]   ;;  %v843_v46 = vld [vmem:[#allocation5 + $0xd4] ss:$8 sps:$4 sm:$0xff]  }
  0x47   :  { %v875_v47 = vld [vmem:[#allocation7 + $0x70] ss:$8 sps:$4 sm:$0xff]   ;;  %v876_v49 = vld [vmem:[#allocation7 + $0x84] ss:$8 sps:$4 sm:$0xff]   ;;  %v878_v51 = vld [vmem:[#allocation7 + $0x80] ss:$8 sps:$4 sm:$0xff]  }
  0x48   :  { %377 = vmatpush1.bf16.msra.mxu0 %v815_v12  ;;  %634 = vmatpush1.bf16.msra.mxu1 %v860_v28  ;;  %v845_v48 = vld [vmem:[#allocation5 + $0xd0] ss:$8 sps:$4 sm:$0xff]   ;;  %v846_v50 = vld [vmem:[#allocation5 + $0xe4] ss:$8 sps:$4 sm:$0xff]   ;;  %v848_v52 = vld [vmem:[#allocation5 + $0xe0] ss:$8 sps:$4 sm:$0xff]  }
  0x49   :  { %378 = vmatprep.subr.bf16.mxu0 %v816_v13  ;;  %635 = vmatprep.subr.bf16.mxu1 %v861_v29  ;;  %v879_v53 = vld [vmem:[#allocation7 + $0x94] ss:$8 sps:$4 sm:$0xff]   ;;  %v881_v55 = vld [vmem:[#allocation7 + $0x90] ss:$8 sps:$4 sm:$0xff]   ;;  %v882_v57 = vld [vmem:[#allocation7 + $0xa4] ss:$8 sps:$4 sm:$0xff]  }
  0x4a   :  { %v849_v54 = vld [vmem:[#allocation5 + $0xf4] ss:$8 sps:$4 sm:$0xff]   ;;  %v851_v56 = vld [vmem:[#allocation5 + $0xf0] ss:$8 sps:$4 sm:$0xff]   ;;  %v884_v58 = vld [vmem:[#allocation7 + $0xa0] ss:$8 sps:$4 sm:$0xff]  }
  0x4b   :  { %v885_v59 = vld [vmem:[#allocation7 + $0xb4] ss:$8 sps:$4 sm:$0xff]   ;;  %v887_v60 = vld [vmem:[#allocation7 + $0xb0] ss:$8 sps:$4 sm:$0xff]   ;;  %v888_v61 = vld [vmem:[#allocation7 + $0xc4] ss:$8 sps:$4 sm:$0xff]  }
  0x4c   :  { %379 = vmatpush1.bf16.msra.mxu0 %v818_v14  ;;  %636 = vmatpush1.bf16.msra.mxu1 %v863_v32  ;;  %v890_v62 = vld [vmem:[#allocation7 + $0xc0] ss:$8 sps:$4 sm:$0xff]   ;;  %v891_v63 = vld [vmem:[#allocation7 + $0xd4] ss:$8 sps:$4 sm:$0xff]   ;;  %v87_v1 = vshrl.u32 %v86_v0, 7  ;;  %vm707_vm10 = vcmask 7168  }
  0x4d   :  { %380 = vmatprep.subr.bf16.mxu0 %v819_v15  ;;  %637 = vmatprep.subr.bf16.mxu1 %v864_v33  ;;  %v79_v4 = vld [vmem:[#allocation3] ss:$4 sm:$0x3]  ;;  %v99_v5 = vld [vmem:[#allocation3 + $0x1] ss:$4 sm:$0x3] }
  0x4e   :  { %v1081_v2 = vsub.s32 0, %v87_v1  ;;  %v1083_v3 = vsub.s32 1, %v87_v1  ;;  %v120_v6 = vld [vmem:[#allocation3 + $0x2] ss:$4 sm:$0x3] }
  0x4f   :  { %v77_v28 = vld [vmem:[%s1126_s1] sm:$0xff] }
  0x50   :  { %381 = vmatpush1.bf16.msra.mxu0 %v821_v16  ;;  %638 = vmatpush1.bf16.msra.mxu1 %v866_v36  ;;  %v89_v8 = vrot.slane %v79_v4, %v1081_v2  ;;  %v93_v9 = vrot.slane %v79_v4, %v1083_v3  ;;  %v108_v10 = vrot.slane %v99_v5, %v1081_v2  ;;  %v156_v32 = vand.u32 1, %v77_v28  ;;  %v457_v1 = vld [vmem:[%s1132_s7] sm:$0x3] }
  0x51   :  { %382 = vmatprep.subr.bf16.mxu0 %v822_v17  ;;  %639 = vmatprep.subr.bf16.mxu1 %v867_v37  ;;  %v112_v11 = vrot.slane %v99_v5, %v1083_v3  ;;  %v129_v12 = vrot.slane %v120_v6, %v1081_v2  ;;  %v133_v13 = vrot.slane %v120_v6, %v1083_v3  ;;  %v672_v4 = vshrl.u32 %v77_v28, 2 }
  0x52   :  { %vm158_vm1 = vcmp.ne.s32.totalorder %v156_v32, 0  ;;  %v462_v5 = vrot.slane %v457_v1, %v1081_v2 }
  0x53   :  { %vm750_vm3 = vmpackc.low %vm158_vm1, %vm158_vm1 }
  0x54   :  { %383 = vmatpush1.bf16.msra.mxu0 %v824_v18  ;;  %640 = vmatpush1.bf16.msra.mxu1 %v869_v39  ;;  %v140_v18 = vld [vmem:[%s1128_s3] sm:$0x3] }
  0x55   :  { %384 = vmatprep.subr.bf16.mxu0 %v825_v19  ;;  %641 = vmatprep.subr.bf16.mxu1 %v870_v41  ;;  %v893_v41 = vld [vmem:[#allocation7 + $0xd0] ss:$8 sps:$4 sm:$0xff]  }
  0x58   :  { %385 = vmatpush1.bf16.msra.mxu0 %v827_v23  ;;  %642 = vmatpush1.bf16.msra.mxu1 %v872_v43  ;;  %v1097_v23 = vld [vmem:[%s1126_s1 + $0x8] sm:$0xff] }
  0x59   :  { %386 = vmatprep.subr.bf16.mxu0 %v828_v26  ;;  %643 = vmatprep.subr.bf16.mxu1 %v873_v45  ;;  %v145_v26 = vrot.slane %v140_v18, %v1081_v2  ;;  %v896_v43 = vld [vmem:[#allocation7 + $0xe0] ss:$8 sps:$4 sm:$0xff]   ;;  %v899_v45 = vld [vmem:[#allocation7 + $0xf0] ss:$8 sps:$4 sm:$0xff]   ;;  %v673_v6 = vshrl.u32 %v1097_v23, 2 }
  0x5c   :  { %387 = vmatpush1.bf16.msra.mxu0 %v830_v27  ;;  %644 = vmatpush1.bf16.msra.mxu1 %v875_v47  ;;  %v149_v27 = vrot.slane %v140_v18, %v1083_v3  ;;  %v414_v47 = vshrl.u32 %v1097_v23, 1 }
  0x5d   :  { %388 = vmatprep.subr.bf16.mxu0 %v831_v30  ;;  %645 = vmatprep.subr.bf16.mxu1 %v876_v49  ;;  %v413_v49 = vshrl.u32 %v77_v28, 1  ;;  %v791_v28 = vld [vmem:[#allocation2] ss:$0 sm:$0xff] }
  0x60   :  { %389 = vmatpush1.bf16.msra.mxu0 %v833_v31  ;;  %646 = vmatpush1.bf16.msra.mxu1 %v878_v51  ;;  %v157_v31 = vand.u32 1, %v1097_v23 }
  0x61   :  { %390 = vmatprep.subr.bf16.mxu0 %v834_v34  ;;  %647 = vmatprep.subr.bf16.mxu1 %v879_v53 }
  0x62   :  { %vm159_vm0 = vcmp.ne.s32.totalorder %v157_v31, 0 }
  0x63   :  { %vm747_vm2 = vmpackc.low %vm159_vm0, %vm159_vm0 }
  0x64   :  { %391 = vmatpush1.bf16.msra.mxu0 %v836_v35  ;;  %648 = vmatpush1.bf16.msra.mxu1 %v881_v55  ;;  %v415_v55 = vand.u32 1, %v413_v49 }
  0x65   :  { %392 = vmatprep.subr.bf16.mxu0 %v837_v38  ;;  %649 = vmatprep.subr.bf16.mxu1 %v882_v57 }
  0x66   :  { %vm417_vm5 = vcmp.ne.s32.totalorder %v415_v55, 0 }
  0x67   :  { %vm788_vm7 = vmpackc.low %vm417_vm5, %vm417_vm5 }
  0x68   :  { %393 = vmatpush1.bf16.msra.mxu0 %v839_v40  ;;  %650 = vmatpush1.bf16.msra.mxu1 %v884_v58 }
  0x69   :  { %394 = vmatprep.subr.bf16.mxu0 %v840_v42  ;;  %651 = vmatprep.subr.bf16.mxu1 %v885_v59  ;;  %v894_v42 = vld [vmem:[#allocation7 + $0xe4] ss:$8 sps:$4 sm:$0xff]  }
  0x6c   :  { %395 = vmatpush1.bf16.msra.mxu0 %v842_v44  ;;  %652 = vmatpush1.bf16.msra.mxu1 %v887_v60  ;;  %v897_v44 = vld [vmem:[#allocation7 + $0xf4] ss:$8 sps:$4 sm:$0xff]  }
  0x6d   :  { %396 = vmatprep.subr.bf16.mxu0 %v843_v46  ;;  %653 = vmatprep.subr.bf16.mxu1 %v888_v61  ;;  %v198_v46 = vld [vmem:[%s1130_s5] sm:$0x3] }
  0x70   :  { %397 = vmatpush1.bf16.msra.mxu0 %v845_v48  ;;  %654 = vmatpush1.bf16.msra.mxu1 %v890_v62  ;;  %v203_v48 = vrot.slane %v198_v46, %v1081_v2 }
  0x71   :  { %398 = vmatprep.subr.bf16.mxu0 %v846_v50  ;;  %655 = vmatprep.subr.bf16.mxu1 %v891_v63  ;;  %v207_v50 = vrot.slane %v198_v46, %v1083_v3 }
  0x74   :  { %399 = vmatpush1.bf16.msra.mxu0 %v848_v52  ;;  %656 = vmatpush1.bf16.msra.mxu1 %v893_v41  ;;  %v416_v52 = vand.u32 1, %v414_v47 }
  0x75   :  { %400 = vmatprep.subr.bf16.mxu0 %v849_v54  ;;  %657 = vmatprep.subr.bf16.mxu1 %v894_v42 }
  0x76   :  { %vm418_vm4 = vcmp.ne.s32.totalorder %v416_v52, 0 }
  0x77   :  { %vm785_vm6 = vmpackc.low %vm418_vm4, %vm418_vm4 }
  0x78   :  { %401 = vmatpush1.bf16.msra.mxu0 %v851_v56  ;;  %658 = vmatpush1.bf16.msra.mxu1 %v896_v43 }
  0x79   :  { %659 = vmatprep.subr.bf16.mxu1 %v897_v44 }
  0x7c   :  { %660 = vmatpush1.bf16.msra.mxu1 %v899_v45 }
  0xb9   :  { %v83_v7 = vpop.permute.xlu0 %82  ;;  %v123_v14 = vpop.permute.xlu1 %122 }
  0xba   :  { %v96_v15 = vmul.f32 %v89_v8, %v83_v7  ;;  %v97_v16 = vmul.f32 %v93_v9, %v83_v7  ;;  %v136_v21 = vmul.f32 %v129_v12, %v123_v14  ;;  %v137_v22 = vmul.f32 %v133_v13, %v123_v14  ;;  %v682_v13 = vld [vmem:[%s1133_s8] sm:$0x3] }
  0xbb   :  { %v466_v7 = vrot.slane %v457_v1, %v1083_v3  ;;  %v674_v9 = vand.u32 1, %v672_v4  ;;  %v675_v12 = vand.u32 1, %v673_v6 }
  0xbd   :  { %vm676_vm8 = vcmp.ne.s32.totalorder %v674_v9, 0  ;;  %vm677_vm9 = vcmp.ne.s32.totalorder %v675_v12, 0 }
  0xbe   :  { %v102_v17 = vpop.permute.xlu0 %101 }
  0xbf   :  { %v115_v19 = vmul.f32 %v108_v10, %v102_v17  ;;  %v116_v20 = vmul.f32 %v112_v11, %v102_v17 }
  0xc1   :  { %v117_v24 = vadd.f32 %v115_v19, %v96_v15  ;;  %v118_v25 = vadd.f32 %v116_v20, %v97_v16  ;;  %v687_v19 = vrot.slane %v682_v13, %v1081_v2 }
  0xc3   :  { %v138_v29 = vadd.f32 %v136_v21, %v117_v24  ;;  %v139_v30 = vadd.f32 %v137_v22, %v118_v25  ;;  %v691_v21 = vrot.slane %v682_v13, %v1083_v3 }
  0xc5   :  { %v152_v33 = vadd.f32 %v145_v26, %v138_v29  ;;  %v153_v34 = vadd.f32 %v149_v27, %v139_v30 }
  0xc7   :  { %v154_v35 = vmax.f32 %v152_v33, 0.0  ;;  %v155_v36 = vmax.f32 %v153_v34, 0.0 }
  0xc9   :  { %v160_v37 = vmul.f32 2.0, %v154_v35  ;;  %v161_v38 = vmul.f32 2.0, %v155_v36 }
  0xcb   :  { %v751_v39 = vpack.c.bf16 %v160_v37, %v160_v37  ;;  %v748_v40 = vpack.c.bf16 %v161_v38, %v161_v38 }
  0xcd   :  { %749 = vmatprep.mubr.msk.bf16.mxu0 %vm747_vm2, %v748_v40 }
  0xce   :  { %752 = vmatmul.mubr.msk.bf16.vlgmr.msra.gmra.mrb[0].mxu0 %vm750_vm3, %v751_v39 }
 0x1a1   :  { %v404_v51 = vpop.f32.mrb[0].mxu0 }
 0x1a2   :  { %v405_v53 = vadd.f32 %v404_v51, %v203_v48  ;;  %v406_v54 = vpop.f32.mrb[1].mxu0 }
 0x1a3   :  { %v407_v56 = vadd.f32 %v406_v54, %v207_v50  ;;  %v408_v57 = vpop.f32.mrb[2].mxu0 }
 0x1a4   :  { %v411_v58 = vmax.f32 %v405_v53, 0.0  ;;  %v409_v59 = vpop.f32.mrb[3].mxu0 }
 0x1a5   :  { %v412_v60 = vmax.f32 %v407_v56, 0.0 }
 0x1a6   :  { %v419_v61 = vmul.f32 2.0, %v411_v58 }
 0x1a7   :  { %v420_v62 = vmul.f32 2.0, %v412_v60 }
 0x1a8   :  { %v789_v0 = vpack.c.bf16 %v419_v61, %v419_v61 }
 0x1a9   :  { %v786_v63 = vpack.c.bf16 %v420_v62, %v420_v62 }
 0x1ab   :  { %787 = vmatprep.mubr.msk.bf16.mxu1 %vm785_vm6, %v786_v63 }
 0x1ac   :  { %790 = vmatmul.mubr.msk.bf16.vlgmr.msra.gmra.mrb[0].mxu1 %vm788_vm7, %v789_v0 }
 0x27f   :  { %v663_v8 = vpop.f32.mrb[0].mxu1 }
 0x280   :  { %v664_v10 = vadd.f32 %v663_v8, %v462_v5  ;;  %v665_v11 = vpop.f32.mrb[1].mxu1 }
 0x281   :  { %v666_v14 = vadd.f32 %v665_v11, %v466_v7  ;;  %v667_v15 = vpop.f32.mrb[2].mxu1 }
 0x282   :  { %v670_v16 = vmax.f32 %v664_v10, 0.0  ;;  %v668_v17 = vpop.f32.mrb[3].mxu1 }
 0x283   :  { %v671_v18 = vmax.f32 %v666_v14, 0.0 }
 0x284   :  { %v678_v20 = vmul.f32 2.0, %v670_v16 }
 0x285   :  { %v679_v22 = vmul.f32 2.0, %v671_v18 }
 0x286   :  { %v680_v23 = vsel %vm676_vm8, %v678_v20, 0.0 }
 0x287   :  { %v681_v24 = vsel %vm677_vm9, %v679_v22, 0.0  ;;  %v694_v25 = vmul.f32 %v687_v19, %v680_v23 }
 0x288   :  { %v695_v26 = vmul.f32 %v691_v21, %v681_v24 }
 0x28a   :  { %v696_v27 = vadd.f32 %v695_v26, %v694_v25 }
 0x28c   :  { %697 = vadd.xlane.f32.xlu1 %v696_v27 }
 0x319   :  { %v698_v29 = vpop.xlane.xlu1 %697 }
 0x31a   :  { %v706_v30 = vadd.f32 %v791_v28, %v698_v29 }
 0x31c   :  { %708 = vst.msk [vmem:[%s1135_s10] sm:$0xff] %vm707_vm10, %v706_v30 }
 0x31d   :  { %713 = vsyncpa [#allocation4], 1 }
 0x31e   :  { %714 = vsyncpa [#allocation6], 1 }

</bundles_post_ra>
